<compile_context>
chip_gen: v5e
topology: v5e:2x2
jax: 0.10.0
libtpu: 0.0.40
codegen_flags: <defaults>
</compile_context>

<pallas_src>
import functools

import jax
import jax.numpy as jnp
from jax.experimental import pallas as pl
from jax.experimental.pallas import tpu as pltpu


def _round_up(x: int, m: int) -> int:
    return (x + m - 1) // m * m


def _vmem_budget_bytes() -> int:
    """Generation-aware VMEM budget: ~3/4 of physical, capped at 96 MiB."""
    try:
        cap = int(pltpu.get_tpu_info().vmem_capacity_bytes)
    except Exception:  # pragma: no cover - conservative fallback (v7x-safe)
        cap = 64 * 1024 * 1024
    return max(32 * 1024 * 1024, min((cap * 3) // 4, 96 * 1024 * 1024))


def _layernorm_relu(h, gamma, beta, *, hidden_dim, h_pad):
    """Two-pass LayerNorm (f32) over the real hidden columns, then ReLU."""
    inv_h = 1.0 / float(hidden_dim)
    mean = jnp.sum(h, axis=-1, keepdims=True) * inv_h   # padded cols are 0
    centered = h - mean
    if h_pad == hidden_dim:
        cm = centered
    else:
        # Mask padded hidden columns out of the variance (they are -mean after
        # centering, so they MUST not contribute).
        col = jax.lax.broadcasted_iota(jnp.int32, (1, h_pad), 1)
        cm = jnp.where(col < hidden_dim, centered, 0.0)
    var = jnp.sum(cm * cm, axis=-1, keepdims=True) * inv_h
    hn = centered * jax.lax.rsqrt(var + 1e-5) * gamma + beta  # padded cols -> 0
    return jnp.maximum(hn, 0.0)


# --------------------------------------------------------------------------
# Kernel A: collapsed-K fused kernel (whole F reduction resident in VMEM).
# --------------------------------------------------------------------------
def _nway_fused_kernel(
    x_ref,      # [TM, F_pad]      bf16 flattened image tile
    we_ref,     # [F_pad, ENC_pad] bf16 encoder weight
    be_ref,     # [1, ENC_pad]     f32 encoder bias
    w1_ref,     # [ENC_pad, H_pad] bf16 dense1 weight
    b1_ref,     # [1, H_pad]       f32 dense1 bias
    gamma_ref,  # [1, H_pad]       f32 layer_norm weight (0 in padded cols)
    beta_ref,   # [1, H_pad]       f32 layer_norm bias   (0 in padded cols)
    w2_ref,     # [H_pad, N_pad]   bf16 dense2 weight
    b2_ref,     # [1, N_pad]       f32 dense2 bias
    out_ref,    # [TM, N_pad]      f32 logits (lane-dense)
    *,
    hidden_dim: int,
    h_pad: int,
):
    enc = (
        jnp.dot(x_ref[...], we_ref[...], preferred_element_type=jnp.float32)
        + be_ref[...]
    )
    h = (
        jnp.dot(enc.astype(jnp.bfloat16), w1_ref[...],
                preferred_element_type=jnp.float32)
        + b1_ref[...]
    )
    # dropout: identity in eval mode (train=False) -- intentionally skipped.
    hn = _layernorm_relu(h, gamma_ref[...], beta_ref[...],
                         hidden_dim=hidden_dim, h_pad=h_pad)
    out = (
        jnp.dot(hn.astype(jnp.bfloat16), w2_ref[...],
                preferred_element_type=jnp.float32)
        + b2_ref[...]
    )
    out_ref[...] = out.astype(out_ref.dtype)


# --------------------------------------------------------------------------
# Kernel B: tiled-K reduction kernel (large F that does not fit VMEM).
# --------------------------------------------------------------------------
def _nway_tiled_kernel(
    x_ref, we_ref, be_ref, w1_ref, b1_ref, gamma_ref, beta_ref, w2_ref,
    b2_ref, out_ref, acc_ref, *, hidden_dim: int, h_pad: int,
):
    k = pl.program_id(1)

    @pl.when(k == 0)
    def _init():
        acc_ref[...] = jnp.zeros_like(acc_ref)

    acc_ref[...] += jnp.dot(
        x_ref[...], we_ref[...], preferred_element_type=jnp.float32
    )

    # Epilogue only on the final reduction step (bias applied exactly once).
    # For very large TM*H_pad the f32 intermediates here could be chunked
    # through a VMEM scratch to bound vreg pressure; at the tile sizes chosen
    # by the wrapper the working set stays small.
    @pl.when(k == pl.num_programs(1) - 1)
    def _finalize():
        enc = acc_ref[...] + be_ref[...]
        h = (
            jnp.dot(enc.astype(jnp.bfloat16), w1_ref[...],
                    preferred_element_type=jnp.float32)
            + b1_ref[...]
        )
        hn = _layernorm_relu(h, gamma_ref[...], beta_ref[...],
                             hidden_dim=hidden_dim, h_pad=h_pad)
        out = (
            jnp.dot(hn.astype(jnp.bfloat16), w2_ref[...],
                    preferred_element_type=jnp.float32)
            + b2_ref[...]
        )
        out_ref[...] = out.astype(out_ref.dtype)


# --------------------------------------------------------------------------
# Wrapper
# --------------------------------------------------------------------------
def nway_classifier_forward(x_nchw, params, hidden_dim, n_way):
    """x_nchw: [B, C, H, W] float32.  Returns logits [B, n_way] float32."""
    we, be, w1, b1, gamma, beta, w2, b2 = params
    B = x_nchw.shape[0]
    x_flat = x_nchw.reshape(B, -1).astype(jnp.float32)
    F = x_flat.shape[1]
    enc_dim = we.shape[1]

    budget = _vmem_budget_bytes()

    # Padded sizes: lane-dense, never padded beyond the next multiple of 128.
    ENC_pad = _round_up(enc_dim, 128)
    H_pad = _round_up(hidden_dim, 128)
    N_pad = _round_up(n_way, 128)      # exactly 128 for n_way=3
    F_pad = _round_up(F, 128)          # pad to 128 only (no wasted TK columns)

    # Head operands footprint (weights + sublane-padded 1-row biases).
    head_bytes = (ENC_pad * H_pad + H_pad * N_pad) * 2 \
        + 8 * (ENC_pad + 3 * H_pad + N_pad) * 4

    def _collapsed_vmem(tm):
        return (2 * tm * F_pad * 2            # x tile (double-buffered bf16)
                + 2 * F_pad * ENC_pad * 2     # encoder weight (conservative x2)
                + 2 * head_bytes              # head operands (conservative x2)
                + 2 * tm * N_pad * 4          # output tile
                + 4 * tm * (ENC_pad + 2 * H_pad) * 4)  # epilogue temporaries

    def _tiled_vmem(tm, tk):
        return (2 * tm * tk * 2               # x tile
                + 2 * tk * ENC_pad * 2        # encoder weight tile
                + head_bytes                  # single-buffered (pl.Buffered(1))
                + 2 * tm * N_pad * 4          # output tile
                + tm * ENC_pad * 4            # f32 accumulator scratch
                + 4 * tm * (ENC_pad + 2 * H_pad) * 4)

    # --- M tile: multiple of 16 (bf16 packs 16 sublanes / vreg).  Bump to 256
    #     only for large batches (v6e/v7x 256x256 MXU) while keeping >=2
    #     parallel M tiles so both v7x TensorCores get work.
    TM = min(128, _round_up(max(B, 1), 16))
    if B >= 512 and _tiled_vmem(256, 512) <= budget:
        TM = 256
    B_pad = _round_up(B, TM)
    num_m = B_pad // TM

    use_collapsed = _collapsed_vmem(TM) <= budget

    if use_collapsed:
        TK = F_pad
        num_k = 1
    else:
        # Largest multiple-of-128 divisor of F_pad (cap 2048) fitting VMEM.
        TK = 128
        cand = F_pad
        while cand >= 128:
            if (F_pad % cand == 0 and cand <= 2048
                    and _tiled_vmem(TM, cand) <= budget):
                TK = cand
                break
            cand -= 128
        num_k = F_pad // TK

    bf16 = jnp.bfloat16
    f32 = jnp.float32

    def pad2(a, rows, cols, dtype):
        # ZERO padding is a correctness invariant (LayerNorm column masking).
        out = jnp.zeros((rows, cols), dtype)
        return out.at[: a.shape[0], : a.shape[1]].set(a.astype(dtype))

    x_p = pad2(x_flat, B_pad, F_pad, bf16)
    we_p = pad2(we, F_pad, ENC_pad, bf16)
    be_p = pad2(be, 1, ENC_pad, f32)
    w1_p = pad2(w1, ENC_pad, H_pad, bf16)
    b1_p = pad2(b1, 1, H_pad, f32)
    g_p = pad2(gamma, 1, H_pad, f32)
    bt_p = pad2(beta, 1, H_pad, f32)
    w2_p = pad2(w2, H_pad, N_pad, bf16)
    b2_p = pad2(b2, 1, N_pad, f32)

    flops = 2 * B_pad * (F_pad * ENC_pad + ENC_pad * H_pad + H_pad * N_pad)
    head_io = (w1_p.size * 2 + w2_p.size * 2
               + (be_p.size + b1_p.size + g_p.size + bt_p.size + b2_p.size) * 4)

    if use_collapsed:
        kernel = functools.partial(_nway_fused_kernel,
                                   hidden_dim=hidden_dim, h_pad=H_pad)
        bytes_accessed = (x_p.size * 2 + we_p.size * 2 + head_io
                          + B_pad * N_pad * 4)
        out_padded = pl.pallas_call(
            kernel,
            out_shape=jax.ShapeDtypeStruct((B_pad, N_pad), jnp.float32),
            grid_spec=pltpu.PrefetchScalarGridSpec(
                num_scalar_prefetch=0,
                grid=(num_m,),
                in_specs=[
                    pl.BlockSpec((TM, F_pad), lambda i: (i, 0)),       # x
                    pl.BlockSpec((F_pad, ENC_pad), lambda i: (0, 0)),  # we
                    pl.BlockSpec((1, ENC_pad), lambda i: (0, 0)),      # be
                    pl.BlockSpec((ENC_pad, H_pad), lambda i: (0, 0)),  # w1
                    pl.BlockSpec((1, H_pad), lambda i: (0, 0)),        # b1
                    pl.BlockSpec((1, H_pad), lambda i: (0, 0)),        # gamma
                    pl.BlockSpec((1, H_pad), lambda i: (0, 0)),        # beta
                    pl.BlockSpec((H_pad, N_pad), lambda i: (0, 0)),    # w2
                    pl.BlockSpec((1, N_pad), lambda i: (0, 0)),        # b2
                ],
                out_specs=pl.BlockSpec((TM, N_pad), lambda i: (i, 0)),
            ),
            compiler_params=pltpu.CompilerParams(
                dimension_semantics=("parallel",),
                vmem_limit_bytes=budget,
            ),
            cost_estimate=pl.CostEstimate(
                flops=flops, transcendentals=B_pad,
                bytes_accessed=bytes_accessed),
        )(x_p, we_p, be_p, w1_p, b1_p, g_p, bt_p, w2_p, b2_p)
    else:
        kernel = functools.partial(_nway_tiled_kernel,
                                   hidden_dim=hidden_dim, h_pad=H_pad)
        # Encoder weights are re-streamed once per M tile (index resets).
        bytes_accessed = (x_p.size * 2 + num_m * we_p.size * 2 + head_io
                          + B_pad * N_pad * 4)

        def _const_spec(shape):
            # Grid-invariant head operand: DMAed once, single-buffered.
            return pl.BlockSpec(shape, lambda i, k: (0, 0),
                                pipeline_mode=pl.Buffered(1))

        out_padded = pl.pallas_call(
            kernel,
            out_shape=jax.ShapeDtypeStruct((B_pad, N_pad), jnp.float32),
            grid_spec=pltpu.PrefetchScalarGridSpec(
                num_scalar_prefetch=0,
                grid=(num_m, num_k),
                in_specs=[
                    pl.BlockSpec((TM, TK), lambda i, k: (i, k)),       # x
                    pl.BlockSpec((TK, ENC_pad), lambda i, k: (k, 0)),  # we
                    _const_spec((1, ENC_pad)),                         # be
                    _const_spec((ENC_pad, H_pad)),                     # w1
                    _const_spec((1, H_pad)),                           # b1
                    _const_spec((1, H_pad)),                           # gamma
                    _const_spec((1, H_pad)),                           # beta
                    _const_spec((H_pad, N_pad)),                       # w2
                    _const_spec((1, N_pad)),                           # b2
                ],
                out_specs=pl.BlockSpec((TM, N_pad), lambda i, k: (i, 0)),
                scratch_shapes=[pltpu.VMEM((TM, ENC_pad), jnp.float32)],
            ),
            compiler_params=pltpu.CompilerParams(
                dimension_semantics=("parallel", "arbitrary"),
                vmem_limit_bytes=budget,
            ),
            cost_estimate=pl.CostEstimate(
                flops=flops, transcendentals=B_pad,
                bytes_accessed=bytes_accessed),
        )(x_p, we_p, be_p, w1_p, b1_p, g_p, bt_p, w2_p, b2_p)

    return out_padded[:B, :n_way]


def make_params(key, in_features, enc_dim, hidden_dim, n_way):
    """Deterministic synthetic parameters (PyTorch-Linear-style uniform init)."""
    ks = jax.random.split(key, 6)

    def linear(kw, kb, fan_in, fan_out):
        bound = 1.0 / jnp.sqrt(fan_in)
        w = jax.random.uniform(kw, (fan_in, fan_out), jnp.float32, -bound, bound)
        b = jax.random.uniform(kb, (1, fan_out), jnp.float32, -bound, bound)
        return w, b

    we, be = linear(ks[0], ks[1], in_features, enc_dim)
    w1, b1 = linear(ks[2], ks[3], enc_dim, hidden_dim)
    gamma = jnp.ones((1, hidden_dim), jnp.float32)   # nn.LayerNorm init
    beta = jnp.zeros((1, hidden_dim), jnp.float32)
    w2, b2 = linear(ks[4], ks[5], hidden_dim, n_way)
    return (we, be, w1, b1, gamma, beta, w2, b2)


def reference_forward(x_nchw, params):
    """Pure-JAX reference matching the kernel's numeric contract (bf16 matmul
    operands, f32 accumulation, f32 LayerNorm / ReLU)."""
    we, be, w1, b1, gamma, beta, w2, b2 = params
    bf16 = jnp.bfloat16
    x = x_nchw.reshape(x_nchw.shape[0], -1)
    h = jnp.dot(x.astype(bf16), we.astype(bf16),
                preferred_element_type=jnp.float32) + be
    h = jnp.dot(h.astype(bf16), w1.astype(bf16),
                preferred_element_type=jnp.float32) + b1
    mean = jnp.mean(h, axis=-1, keepdims=True)
    var = jnp.mean((h - mean) ** 2, axis=-1, keepdims=True)
    h = (h - mean) * jax.lax.rsqrt(var + 1e-5) * gamma + beta
    h = jnp.maximum(h, 0.0)
    return jnp.dot(h.astype(bf16), w2.astype(bf16),
                   preferred_element_type=jnp.float32) + b2


if __name__ == "__main__":
    B, C, H, W = 2, 4, 16, 16
    ENC_DIM = 32       # synthetic encoder_def.output_dim
    HIDDEN_DIM = 256   # NWayClassifier default hidden_dim
    N_WAY = 3          # NWayClassifier default n_way

    key = jax.random.PRNGKey(0)
    kx, kp = jax.random.split(key)
    x = jax.random.normal(kx, (B, C, H, W), jnp.float32)
    params = make_params(kp, C * H * W, ENC_DIM, HIDDEN_DIM, N_WAY)

    logits = nway_classifier_forward(x, params, HIDDEN_DIM, N_WAY)
    logits = jax.block_until_ready(logits)

    ref = reference_forward(x, params)
    assert logits.shape == (B, N_WAY)
    max_err = jnp.max(jnp.abs(logits - ref))
    assert jnp.allclose(logits, ref, atol=2e-2, rtol=2e-2), (
        f"max abs err {max_err}"
    )

    print("KERNEL_OK")
</pallas_src>

<mosaic_0001>
module attributes {stable_mosaic.version = 11 : i64} {
  func.func @_nway_fused_kernel(%arg0: i32, %arg1: memref<16x1024xbf16, #tpu.memory_space<vmem>>, %arg2: memref<1024x128xbf16, #tpu.memory_space<vmem>>, %arg3: memref<1x128xf32, #tpu.memory_space<vmem>>, %arg4: memref<128x256xbf16, #tpu.memory_space<vmem>>, %arg5: memref<1x256xf32, #tpu.memory_space<vmem>>, %arg6: memref<1x256xf32, #tpu.memory_space<vmem>>, %arg7: memref<1x256xf32, #tpu.memory_space<vmem>>, %arg8: memref<256x128xbf16, #tpu.memory_space<vmem>>, %arg9: memref<1x128xf32, #tpu.memory_space<vmem>>, %arg10: memref<16x128xf32, #tpu.memory_space<vmem>>) attributes {dimension_semantics = [#tpu.dimension_semantics<parallel>], iteration_bounds = array<i64: 1>, scalar_prefetch = 0 : i64, scratch_operands = 0 : i64, tpu.core_type = #tpu.core_type<tc>, window_params = [{transform_indices = @transform_0, window_bounds = array<i64: 16, 1024>}, {pipeline_mode = #tpu.pipeline_mode<synchronous>, transform_indices = @transform_1, window_bounds = array<i64: 1024, 128>}, {pipeline_mode = #tpu.pipeline_mode<synchronous>, transform_indices = @transform_2, window_bounds = array<i64: 1, 128>}, {pipeline_mode = #tpu.pipeline_mode<synchronous>, transform_indices = @transform_3, window_bounds = array<i64: 128, 256>}, {pipeline_mode = #tpu.pipeline_mode<synchronous>, transform_indices = @transform_4, window_bounds = array<i64: 1, 256>}, {pipeline_mode = #tpu.pipeline_mode<synchronous>, transform_indices = @transform_5, window_bounds = array<i64: 1, 256>}, {pipeline_mode = #tpu.pipeline_mode<synchronous>, transform_indices = @transform_6, window_bounds = array<i64: 1, 256>}, {pipeline_mode = #tpu.pipeline_mode<synchronous>, transform_indices = @transform_7, window_bounds = array<i64: 256, 128>}, {pipeline_mode = #tpu.pipeline_mode<synchronous>, transform_indices = @transform_8, window_bounds = array<i64: 1, 128>}, {transform_indices = @transform_9, window_bounds = array<i64: 16, 128>}]} {
    %c0 = arith.constant 0 : index
    %c0_0 = arith.constant 0 : index
    %0 = vector.load %arg1[%c0, %c0_0] : memref<16x1024xbf16, #tpu.memory_space<vmem>>, vector<16x1024xbf16>
    %c0_1 = arith.constant 0 : index
    %c0_2 = arith.constant 0 : index
    %1 = vector.load %arg2[%c0_1, %c0_2] : memref<1024x128xbf16, #tpu.memory_space<vmem>>, vector<1024x128xbf16>
    %cst = arith.constant dense<0.000000e+00> : vector<16x128xf32>
    %2 = tpu.matmul %0, %1, %cst {dimension_numbers = #tpu.dot_dimension_numbers<[1], [0], [0], [1], [0, 0, 1, 1], [], []>} : vector<16x1024xbf16>, vector<1024x128xbf16>, vector<16x128xf32> -> vector<16x128xf32>
    %c0_3 = arith.constant 0 : index
    %c0_4 = arith.constant 0 : index
    %3 = vector.load %arg3[%c0_3, %c0_4] : memref<1x128xf32, #tpu.memory_space<vmem>>, vector<1x128xf32>
    %4 = vector.broadcast %3 : vector<1x128xf32> to vector<16x128xf32>
    %5 = arith.addf %2, %4 : vector<16x128xf32>
    %6 = arith.truncf %5 : vector<16x128xf32> to vector<16x128xbf16>
    %c0_5 = arith.constant 0 : index
    %c0_6 = arith.constant 0 : index
    %7 = vector.load %arg4[%c0_5, %c0_6] : memref<128x256xbf16, #tpu.memory_space<vmem>>, vector<128x256xbf16>
    %cst_7 = arith.constant dense<0.000000e+00> : vector<16x256xf32>
    %8 = tpu.matmul %6, %7, %cst_7 {dimension_numbers = #tpu.dot_dimension_numbers<[1], [0], [0], [1], [0, 0, 1, 1], [], []>} : vector<16x128xbf16>, vector<128x256xbf16>, vector<16x256xf32> -> vector<16x256xf32>
    %c0_8 = arith.constant 0 : index
    %c0_9 = arith.constant 0 : index
    %9 = vector.load %arg5[%c0_8, %c0_9] : memref<1x256xf32, #tpu.memory_space<vmem>>, vector<1x256xf32>
    %10 = vector.broadcast %9 : vector<1x256xf32> to vector<16x256xf32>
    %11 = arith.addf %8, %10 : vector<16x256xf32>
    %c0_10 = arith.constant 0 : index
    %c0_11 = arith.constant 0 : index
    %12 = vector.load %arg6[%c0_10, %c0_11] : memref<1x256xf32, #tpu.memory_space<vmem>>, vector<1x256xf32>
    %c0_12 = arith.constant 0 : index
    %c0_13 = arith.constant 0 : index
    %13 = vector.load %arg7[%c0_12, %c0_13] : memref<1x256xf32, #tpu.memory_space<vmem>>, vector<1x256xf32>
    %cst_14 = arith.constant dense<0.000000e+00> : vector<16xf32>
    %14 = vector.multi_reduction <add>, %11, %cst_14 [1] : vector<16x256xf32> to vector<16xf32>
    %15 = vector.shape_cast %14 : vector<16xf32> to vector<16x1xf32>
    %cst_15 = arith.constant 3.906250e-03 : f32
    %16 = vector.broadcast %cst_15 : f32 to vector<16x1xf32>
    %17 = arith.mulf %15, %16 : vector<16x1xf32>
    %18 = vector.broadcast %17 : vector<16x1xf32> to vector<16x256xf32>
    %19 = arith.subf %11, %18 : vector<16x256xf32>
    %20 = arith.mulf %19, %19 : vector<16x256xf32>
    %cst_16 = arith.constant dense<0.000000e+00> : vector<16xf32>
    %21 = vector.multi_reduction <add>, %20, %cst_16 [1] : vector<16x256xf32> to vector<16xf32>
    %22 = vector.shape_cast %21 : vector<16xf32> to vector<16x1xf32>
    %cst_17 = arith.constant 3.906250e-03 : f32
    %23 = vector.broadcast %cst_17 : f32 to vector<16x1xf32>
    %24 = arith.mulf %22, %23 : vector<16x1xf32>
    %cst_18 = arith.constant 9.99999974E-6 : f32
    %25 = vector.broadcast %cst_18 : f32 to vector<16x1xf32>
    %26 = arith.addf %24, %25 : vector<16x1xf32>
    %27 = math.rsqrt %26 : vector<16x1xf32>
    %28 = vector.broadcast %27 : vector<16x1xf32> to vector<16x256xf32>
    %29 = arith.mulf %19, %28 : vector<16x256xf32>
    %30 = vector.broadcast %12 : vector<1x256xf32> to vector<16x256xf32>
    %31 = arith.mulf %29, %30 : vector<16x256xf32>
    %32 = vector.broadcast %13 : vector<1x256xf32> to vector<16x256xf32>
    %33 = arith.addf %31, %32 : vector<16x256xf32>
    %cst_19 = arith.constant 0.000000e+00 : f32
    %34 = vector.broadcast %cst_19 : f32 to vector<16x256xf32>
    %35 = arith.maximumf %33, %34 : vector<16x256xf32>
    %36 = arith.truncf %35 : vector<16x256xf32> to vector<16x256xbf16>
    %c0_20 = arith.constant 0 : index
    %c0_21 = arith.constant 0 : index
    %37 = vector.load %arg8[%c0_20, %c0_21] : memref<256x128xbf16, #tpu.memory_space<vmem>>, vector<256x128xbf16>
    %cst_22 = arith.constant dense<0.000000e+00> : vector<16x128xf32>
    %38 = tpu.matmul %36, %37, %cst_22 {dimension_numbers = #tpu.dot_dimension_numbers<[1], [0], [0], [1], [0, 0, 1, 1], [], []>} : vector<16x256xbf16>, vector<256x128xbf16>, vector<16x128xf32> -> vector<16x128xf32>
    %c0_23 = arith.constant 0 : index
    %c0_24 = arith.constant 0 : index
    %39 = vector.load %arg9[%c0_23, %c0_24] : memref<1x128xf32, #tpu.memory_space<vmem>>, vector<1x128xf32>
    %40 = vector.broadcast %39 : vector<1x128xf32> to vector<16x128xf32>
    %41 = arith.addf %38, %40 : vector<16x128xf32>
    %c0_25 = arith.constant 0 : index
    %c0_26 = arith.constant 0 : index
    %42 = vector.load %arg10[%c0_25, %c0_26] : memref<16x128xf32, #tpu.memory_space<vmem>>, vector<16x128xf32>
    tpu.vector_store %arg10[%c0_25, %c0_26], %41 {strides = array<i32>} : memref<16x128xf32, #tpu.memory_space<vmem>>, vector<16x128xf32>,
    return
  }
  func.func @transform_0(%arg0: i32) -> (i32, i32) {
    %c0_i32 = arith.constant 0 : i32
    %c0_i32_0 = arith.constant 0 : i32
    return %arg0, %c0_i32 : i32, i32
  }
  func.func @transform_1(%arg0: i32) -> (i32, i32) {
    %c0_i32 = arith.constant 0 : i32
    %c0_i32_0 = arith.constant 0 : i32
    %c0_i32_1 = arith.constant 0 : i32
    return %c0_i32, %c0_i32_0 : i32, i32
  }
  func.func @transform_2(%arg0: i32) -> (i32, i32) {
    %c0_i32 = arith.constant 0 : i32
    %c0_i32_0 = arith.constant 0 : i32
    %c0_i32_1 = arith.constant 0 : i32
    return %c0_i32, %c0_i32_0 : i32, i32
  }
  func.func @transform_3(%arg0: i32) -> (i32, i32) {
    %c0_i32 = arith.constant 0 : i32
    %c0_i32_0 = arith.constant 0 : i32
    %c0_i32_1 = arith.constant 0 : i32
    return %c0_i32, %c0_i32_0 : i32, i32
  }
  func.func @transform_4(%arg0: i32) -> (i32, i32) {
    %c0_i32 = arith.constant 0 : i32
    %c0_i32_0 = arith.constant 0 : i32
    %c0_i32_1 = arith.constant 0 : i32
    return %c0_i32, %c0_i32_0 : i32, i32
  }
  func.func @transform_5(%arg0: i32) -> (i32, i32) {
    %c0_i32 = arith.constant 0 : i32
    %c0_i32_0 = arith.constant 0 : i32
    %c0_i32_1 = arith.constant 0 : i32
    return %c0_i32, %c0_i32_0 : i32, i32
  }
  func.func @transform_6(%arg0: i32) -> (i32, i32) {
    %c0_i32 = arith.constant 0 : i32
    %c0_i32_0 = arith.constant 0 : i32
    %c0_i32_1 = arith.constant 0 : i32
    return %c0_i32, %c0_i32_0 : i32, i32
  }
  func.func @transform_7(%arg0: i32) -> (i32, i32) {
    %c0_i32 = arith.constant 0 : i32
    %c0_i32_0 = arith.constant 0 : i32
    %c0_i32_1 = arith.constant 0 : i32
    return %c0_i32, %c0_i32_0 : i32, i32
  }
  func.func @transform_8(%arg0: i32) -> (i32, i32) {
    %c0_i32 = arith.constant 0 : i32
    %c0_i32_0 = arith.constant 0 : i32
    %c0_i32_1 = arith.constant 0 : i32
    return %c0_i32, %c0_i32_0 : i32, i32
  }
  func.func @transform_9(%arg0: i32) -> (i32, i32) {
    %c0_i32 = arith.constant 0 : i32
    %c0_i32_0 = arith.constant 0 : i32
    return %arg0, %c0_i32 : i32, i32
  }
}

</mosaic_0001>

<bundles_post_ra>
// kernel: tpu_custom_call.1
= control target key start
LH: loop header
LB: loop body
LE: loop exit
PB: predicated region body
PF: predicated region fallthrough
CT: control target
= control target key end

     0   :  { %14 = vsyncpa [#allocation3], 0  ;;  %s2032_s0 = inlined_call_operand.hbm [shape: bf16[16,1024], index: 0, kind: input, shape index: {}]   ;;  %s2033_s1 = inlined_call_operand.hbm [shape: bf16[1024,128], index: 1, kind: input, shape index: {}]   ;;  %s2034_s2 = inlined_call_operand.hbm [shape: f32[1,128], index: 2, kind: input, shape index: {}]   ;;  %s2035_s3 = inlined_call_operand.hbm [shape: bf16[128,256], index: 3, kind: input, shape index: {}]   ;;  %s2036_s4 = inlined_call_operand.vmem [shape: f32[1,256], index: 4, kind: input, shape index: {}]   ;;  %s2037_s5 = inlined_call_operand.vmem [shape: f32[1,256], index: 5, kind: input, shape index: {}]   ;;  %s2038_s6 = inlined_call_operand.hbm [shape: f32[1,256], index: 6, kind: input, shape index: {}]   ;;  %s2039_s7 = inlined_call_operand.hbm [shape: bf16[256,128], index: 7, kind: input, shape index: {}]   ;;  %s2040_s8 = inlined_call_operand.vmem [shape: f32[1,128], index: 8, kind: input, shape index: {}]   ;;  %s2041_s9 = inlined_call_operand.hbm [shape: f32[16,128], index: 9, kind: output, shape index: {}]  }
   0x1   :  { %15 = vsyncpa [#allocation6], 0 }
   0x2   :  { %16 = vsyncpa [#allocation9], 0 }
   0x3   :  { %17 = vsyncpa [#allocation12], 0  ;;  %s36_s11 = sshll.u32 %s2033_s1, 4  ;;  %s37_s11 = int_to_ptr.hbm [resolvable:$true] %s36_s11 }
   0x4   :  { %18 = vsyncpa [#allocation4], 0  ;;  %s1907_s12 = smov [#allocation5]   ;;  %s60_s16 = sshll.u32 %s2035_s3, 4  ;;  %s61_s16 = int_to_ptr.hbm [resolvable:$true] %s60_s16 }
   0x5   :  { %s38_s13 = sshll.u32 %s1907_s12, 4  ;;  %s1908_s17 = smov 64   ;;  %s39_s13 = int_to_ptr.vmem [resolvable:$true] %s38_s13 }
   0x6   :  { %s1909_s18 = smov 4   ;;  %s1910_s19 = smov [#allocation8]  }
   0x7   :  { %44 = dma.hbm_to_vmem [thread:$0]  %s37_s11, 8192, %s39_s13, [#allocation6], %s1908_s17, %s1908_s17, %s1909_s18  }
   0x8   :  { %s62_s20 = sshll.u32 %s1910_s19, 4  ;;  %s1911_s1 = smov 128   ;;  %s63_s20 = int_to_ptr.vmem [resolvable:$true] %s62_s20 }
   0x9   :  { %s1912_s21 = smov 8   ;;  %s23_s3 = sshll.u32 %s2032_s0, 4  ;;  %s24_s3 = int_to_ptr.hbm [resolvable:$true] %s23_s3 }
   0xa   :  { %68 = dma.hbm_to_vmem [thread:$0]  %s61_s16, 2048, %s63_s20, [#allocation9], %s1911_s1, %s1911_s1, %s1912_s21  }
   0xb   :  { %s1913_s24 = smov [#allocation2]   ;;  %s50_s28 = sshll.u32 %s2034_s2, 4  ;;  %s51_s28 = int_to_ptr.hbm [resolvable:$true] %s50_s28 }
   0xc   :  { %s25_s25 = sshll.u32 %s1913_s24, 4  ;;  %s1914_s29 = smov 512   ;;  %s26_s25 = int_to_ptr.vmem [resolvable:$true] %s25_s25 }
   0xd   :  { %s1915_s30 = smov 32   ;;  %s1916_s10 = smov [#allocation7]  }
   0xe   :  { %31 = dma.hbm_to_vmem [thread:$0]  %s24_s3, 1024, %s26_s25, [#allocation3], %s1914_s29, %s1914_s29, %s1915_s30  }
   0xf   :  { %s52_s11 = sshll.u32 %s1916_s10, 4  ;;  %s78_s14 = sshll.u32 %s2038_s6, 4  ;;  %s53_s11 = int_to_ptr.vmem [resolvable:$true] %s52_s11  ;;  %s79_s14 = int_to_ptr.hbm [resolvable:$true] %s78_s14 }
  0x10   :  { %55 = dma.hbm_to_vmem [thread:$0]  %s51_s28, 16, %s53_s11, [#allocation6]  }
  0x11   :  { %s88_s16 = sshll.u32 %s2039_s7, 4  ;;  %s1917_s19 = smov [#allocation10]   ;;  %s89_s16 = int_to_ptr.hbm [resolvable:$true] %s88_s16 }
  0x12   :  { %s80_s20 = sshll.u32 %s1917_s19, 4  ;;  %s1918_s2 = smov [#allocation11]   ;;  %s81_s20 = int_to_ptr.vmem [resolvable:$true] %s80_s20 }
  0x13   :  { %83 = dma.hbm_to_vmem [thread:$0]  %s79_s14, 32, %s81_s20, [#allocation9]  }
  0x14   :  { %s90_s22 = sshll.u32 %s1918_s2, 4  ;;  %s91_s22 = int_to_ptr.vmem [resolvable:$true] %s90_s22 }
  0x15   :  { %96 = dma.hbm_to_vmem [thread:$0]  %s89_s16, 2048, %s91_s22, [#allocation12], %s1908_s17, %s1908_s17, %s1909_s18  }
  0x16   :  { %1897 = dma.done.wait [#allocation3], 1024  }
  0x17   :  { %1898 = vsyncadd [#allocation3], 4294966272 }
  0x18   :  { %1899 = dma.done.wait [#allocation6], 8208  }
  0x19   :  { %1900 = vsyncadd [#allocation6], 4294959088 }
  0x1a   :  { %1901 = dma.done.wait [#allocation9], 2080  }
  0x1b   :  { %1902 = vsyncadd [#allocation9], 4294965216 }
  0x1c   :  { %1903 = dma.done.wait [#allocation12], 2048  }
  0x1d   :  { %1904 = vsyncadd [#allocation12], 4294965248  ;;  %v1621_v0 = vld [vmem:[#allocation5 + $0x38] sm:$0xff]  ;;  %v1620_v4 = vld [vmem:[#allocation5 + $0x30] sm:$0xff]  ;;  %s1919_s23 = smov [#allocation13]   ;;  %s1174_s26 = sshll.u32 %s2041_s9, 4  ;;  %s1175_s26 = int_to_ptr.hbm [resolvable:$true] %s1174_s26 }
  0x1e   :  { %v1629_v1 = vld [vmem:[#allocation5 + $0x78] sm:$0xff]  ;;  %687 = vmatpush.bf16.msra.mxu0 %v1621_v0  ;;  %v1628_v5 = vld [vmem:[#allocation5 + $0x70] sm:$0xff]  ;;  %v1619_v8 = vld [vmem:[#allocation5 + $0x28] sm:$0xff]  ;;  %s1172_s3 = sshll.u32 %s1919_s23, 4  ;;  %s1173_s3 = int_to_ptr.vmem [resolvable:$true] %s1172_s3 }
  0x1f   :  { %v1637_v2 = vld [vmem:[#allocation5 + $0xb8] sm:$0xff]  ;;  %701 = vmatpush.bf16.msra.mxu1 %v1629_v1  ;;  %v1636_v6 = vld [vmem:[#allocation5 + $0xb0] sm:$0xff]  ;;  %v1627_v9 = vld [vmem:[#allocation5 + $0x68] sm:$0xff] }
  0x20   :  { %v1645_v3 = vld [vmem:[#allocation5 + $0xf8] sm:$0xff]  ;;  %715 = vmatpush.bf16.msra.mxu2 %v1637_v2  ;;  %v1644_v7 = vld [vmem:[#allocation5 + $0xf0] sm:$0xff]  ;;  %v1635_v10 = vld [vmem:[#allocation5 + $0xa8] sm:$0xff] }
  0x21   :  { %729 = vmatpush.bf16.msra.mxu3 %v1645_v3  ;;  %v1643_v11 = vld [vmem:[#allocation5 + $0xe8] sm:$0xff]  ;;  %v1618_v12 = vld [vmem:[#allocation5 + $0x20] sm:$0xff]  ;;  %v1617_v16 = vld [vmem:[#allocation5 + $0x18] sm:$0xff] }
  0x22   :  { %688 = vmatpush.bf16.msra.mxu0 %v1620_v4  ;;  %v1626_v13 = vld [vmem:[#allocation5 + $0x60] sm:$0xff]  ;;  %v1625_v17 = vld [vmem:[#allocation5 + $0x58] sm:$0xff]  ;;  %v1616_v20 = vld [vmem:[#allocation5 + $0x10] sm:$0xff] }
  0x23   :  { %702 = vmatpush.bf16.msra.mxu1 %v1628_v5  ;;  %v1634_v14 = vld [vmem:[#allocation5 + $0xa0] sm:$0xff]  ;;  %v1633_v18 = vld [vmem:[#allocation5 + $0x98] sm:$0xff]  ;;  %v1624_v21 = vld [vmem:[#allocation5 + $0x50] sm:$0xff] }
  0x24   :  { %716 = vmatpush.bf16.msra.mxu2 %v1636_v6  ;;  %v1642_v15 = vld [vmem:[#allocation5 + $0xe0] sm:$0xff]  ;;  %v1641_v19 = vld [vmem:[#allocation5 + $0xd8] sm:$0xff]  ;;  %v1632_v22 = vld [vmem:[#allocation5 + $0x90] sm:$0xff] }
  0x25   :  { %730 = vmatpush.bf16.msra.mxu3 %v1644_v7  ;;  %v1640_v23 = vld [vmem:[#allocation5 + $0xd0] sm:$0xff]  ;;  %v1615_v24 = vld [vmem:[#allocation5 + $0x8] sm:$0xff]  ;;  %v1614_v28 = vld [vmem:[#allocation5] sm:$0xff] }
  0x26   :  { %689 = vmatpush.bf16.msra.mxu0 %v1619_v8  ;;  %v1623_v25 = vld [vmem:[#allocation5 + $0x48] sm:$0xff]  ;;  %v1622_v29 = vld [vmem:[#allocation5 + $0x40] sm:$0xff]  ;;  %v1653_v32 = vld [vmem:[#allocation5 + $0x138] sm:$0xff] }
  0x27   :  { %703 = vmatpush.bf16.msra.mxu1 %v1627_v9  ;;  %v1631_v26 = vld [vmem:[#allocation5 + $0x88] sm:$0xff]  ;;  %v1630_v30 = vld [vmem:[#allocation5 + $0x80] sm:$0xff]  ;;  %v1661_v33 = vld [vmem:[#allocation5 + $0x178] sm:$0xff] }
  0x28   :  { %717 = vmatpush.bf16.msra.mxu2 %v1635_v10  ;;  %v1639_v27 = vld [vmem:[#allocation5 + $0xc8] sm:$0xff]  ;;  %v1638_v31 = vld [vmem:[#allocation5 + $0xc0] sm:$0xff]  ;;  %v1669_v42 = vld [vmem:[#allocation5 + $0x1b8] sm:$0xff] }
  0x29   :  { %731 = vmatpush.bf16.msra.mxu3 %v1643_v11  ;;  %v1200_v34 = vld [vmem:[#allocation2 + $0x8] sm:$0xf]  ;;  %v1192_v36 = vld [vmem:[#allocation2] sm:$0xf]  ;;  %v1607_v38 = vld [vmem:[#allocation2 + $0xc] sm:$0xf] }
  0x2a   :  { %690 = vmatpush.bf16.msra.mxu0 %v1618_v12  ;;  %v1611_v35 = vld [vmem:[#allocation2 + $0x24] sm:$0xf0]  ;;  %v1610_v37 = vld [vmem:[#allocation2 + $0x1c] sm:$0xf0]  ;;  %v1202_v39 = vld [vmem:[#allocation2 + $0x28] sm:$0xf0] }
  0x2b   :  { %704 = vmatpush.bf16.msra.mxu1 %v1626_v13  ;;  %v1606_v40 = vld [vmem:[#allocation2 + $0x4] sm:$0xf]  ;;  %v1677_v43 = vld [vmem:[#allocation5 + $0x1f8] sm:$0xff]  ;;  %v1201_v44 = vor.u32 %v1611_v35, %v1200_v34  ;;  %v1193_v45 = vor.u32 %v1610_v37, %v1192_v36  ;;  %v1205_v46 = vor.u32 %v1607_v38, %v1202_v39  ;;  %v1652_v48 = vld [vmem:[#allocation5 + $0x130] sm:$0xff] }
  0x2c   :  { %718 = vmatpush.bf16.msra.mxu2 %v1634_v14  ;;  %v1194_v41 = vld [vmem:[#allocation2 + $0x20] sm:$0xf0]  ;;  %v1660_v49 = vld [vmem:[#allocation5 + $0x170] sm:$0xff]  ;;  %v1651_v52 = vld [vmem:[#allocation5 + $0x128] sm:$0xff] }
  0x2d   :  { %732 = vmatpush.bf16.msra.mxu3 %v1642_v15  ;;  %v1197_v47 = vor.u32 %v1606_v40, %v1194_v41  ;;  %v1668_v50 = vld [vmem:[#allocation5 + $0x1b0] sm:$0xff]  ;;  %v1659_v53 = vld [vmem:[#allocation5 + $0x168] sm:$0xff]  ;;  %v1650_v56 = vld [vmem:[#allocation5 + $0x120] sm:$0xff] }
  0x2e   :  { %691 = vmatpush.bf16.msra.mxu0 %v1617_v16  ;;  %v1676_v51 = vld [vmem:[#allocation5 + $0x1f0] sm:$0xff]  ;;  %v1667_v54 = vld [vmem:[#allocation5 + $0x1a8] sm:$0xff]  ;;  %v1658_v57 = vld [vmem:[#allocation5 + $0x160] sm:$0xff] }
  0x2f   :  { %705 = vmatpush.bf16.msra.mxu1 %v1625_v17  ;;  %v1675_v55 = vld [vmem:[#allocation5 + $0x1e8] sm:$0xff]  ;;  %v1666_v58 = vld [vmem:[#allocation5 + $0x1a0] sm:$0xff]  ;;  %v1649_v60 = vld [vmem:[#allocation5 + $0x118] sm:$0xff] }
  0x30   :  { %719 = vmatpush.bf16.msra.mxu2 %v1633_v18  ;;  %v1674_v59 = vld [vmem:[#allocation5 + $0x1e0] sm:$0xff]  ;;  %v1657_v61 = vld [vmem:[#allocation5 + $0x158] sm:$0xff]  ;;  %v1648_v0 = vld [vmem:[#allocation5 + $0x110] sm:$0xff] }
  0x31   :  { %733 = vmatpush.bf16.msra.mxu3 %v1641_v19  ;;  %v1665_v62 = vld [vmem:[#allocation5 + $0x198] sm:$0xff]  ;;  %v1656_v1 = vld [vmem:[#allocation5 + $0x150] sm:$0xff]  ;;  %v1647_v4 = vld [vmem:[#allocation5 + $0x108] sm:$0xff] }
  0x32   :  { %692 = vmatpush.bf16.msra.mxu0 %v1616_v20  ;;  %v1673_v63 = vld [vmem:[#allocation5 + $0x1d8] sm:$0xff]  ;;  %v1664_v2 = vld [vmem:[#allocation5 + $0x190] sm:$0xff]  ;;  %v1655_v5 = vld [vmem:[#allocation5 + $0x148] sm:$0xff] }
  0x33   :  { %706 = vmatpush.bf16.msra.mxu1 %v1624_v21  ;;  %v1672_v3 = vld [vmem:[#allocation5 + $0x1d0] sm:$0xff]  ;;  %v1663_v6 = vld [vmem:[#allocation5 + $0x188] sm:$0xff]  ;;  %v1646_v8 = vld [vmem:[#allocation5 + $0x100] sm:$0xff] }
  0x34   :  { %720 = vmatpush.bf16.msra.mxu2 %v1632_v22  ;;  %v1671_v7 = vld [vmem:[#allocation5 + $0x1c8] sm:$0xff]  ;;  %v1654_v9 = vld [vmem:[#allocation5 + $0x140] sm:$0xff]  ;;  %v1208_v12 = vld [vmem:[#allocation2 + $0x10] sm:$0xf] }
  0x35   :  { %734 = vmatpush.bf16.msra.mxu3 %v1640_v23  ;;  %v1662_v10 = vld [vmem:[#allocation5 + $0x180] sm:$0xff]  ;;  %v1612_v13 = vld [vmem:[#allocation2 + $0x2c] sm:$0xf0]  ;;  %v1608_v14 = vld [vmem:[#allocation2 + $0x14] sm:$0xf] }
  0x36   :  { %693 = vmatpush.bf16.msra.mxu0 %v1615_v24  ;;  %v1670_v11 = vld [vmem:[#allocation5 + $0x1c0] sm:$0xff]  ;;  %v1210_v15 = vld [vmem:[#allocation2 + $0x30] sm:$0xf0]  ;;  %v1216_v16 = vld [vmem:[#allocation2 + $0x18] sm:$0xf]  ;;  %v1209_v20 = vor.u32 %v1612_v13, %v1208_v12 }
  0x37   :  { %707 = vmatpush.bf16.msra.mxu1 %v1623_v25  ;;  %v1613_v17 = vld [vmem:[#allocation2 + $0x34] sm:$0xf0]  ;;  %v1609_v18 = vld [vmem:[#allocation2 + $0x1c] sm:$0xf]  ;;  %v1213_v21 = vor.u32 %v1608_v14, %v1210_v15  ;;  %v1536_v24 = vld [vmem:[#allocation8 + $0x70] sm:$0xf] }
  0x38   :  { %721 = vmatpush.bf16.msra.mxu2 %v1631_v26  ;;  %v1218_v19 = vld [vmem:[#allocation2 + $0x38] sm:$0xf0]  ;;  %v1217_v22 = vor.u32 %v1613_v17, %v1216_v16  ;;  %v1692_v26 = vld [vmem:[#allocation8 + $0x74] sm:$0xf]  ;;  %v1530_v34 = vld [vmem:[#allocation8 + $0x68] sm:$0xf0] }
  0x39   :  { %735 = vmatpush.bf16.msra.mxu3 %v1639_v27  ;;  %v1221_v23 = vor.u32 %v1609_v18, %v1218_v19  ;;  %v1693_v25 = vld [vmem:[#allocation8 + $0x74] sm:$0xf0]  ;;  %v1520_v36 = vld [vmem:[#allocation8 + $0x50] sm:$0xf]  ;;  %v1688_v38 = vld [vmem:[#allocation8 + $0x54] sm:$0xf] }
  0x3a   :  { %694 = vmatpush.bf16.msra.mxu0 %v1614_v28  ;;  %v1537_v27 = vor.u32 %v1693_v25, %v1536_v24  ;;  %v1538_v28 = vld [vmem:[#allocation8 + $0x78] sm:$0xf0]  ;;  %v1689_v37 = vld [vmem:[#allocation8 + $0x54] sm:$0xf0] }
  0x3b   :  { %708 = vmatpush.bf16.msra.mxu1 %v1622_v29  ;;  %v1541_v29 = vor.u32 %v1692_v26, %v1538_v28  ;;  %v1522_v39 = vld [vmem:[#allocation8 + $0x58] sm:$0xf0]  ;;  %v1521_v40 = vor.u32 %v1689_v37, %v1520_v36 }
  0x3c   :  { %722 = vmatpush.bf16.msra.mxu2 %v1630_v30  ;;  %v1528_v30 = vld [vmem:[#allocation8 + $0x60] sm:$0xf]  ;;  %v1525_v41 = vor.u32 %v1688_v38, %v1522_v39  ;;  %v1723_v12 = vld [vmem:[#allocation7] ss:$0 sm:$0xff] }
  0x3d   :  { %736 = vmatpush.bf16.msra.mxu3 %v1638_v31  ;;  %695 = vmatmul.bf16.vlgmr.msra.gmra.mxu0 %v1193_v45  ;;  %v1691_v31 = vld [vmem:[#allocation8 + $0x64] sm:$0xf0] }
  0x3e   :  { %743 = vmatpush.bf16.msrb.mxu0 %v1653_v32  ;;  %709 = vmatmul.bf16.vlgmr.msra.gmra.mxu1 %v1197_v47  ;;  %v1690_v32 = vld [vmem:[#allocation8 + $0x64] sm:$0xf] }
  0x3f   :  { %757 = vmatpush.bf16.msrb.mxu1 %v1661_v33  ;;  %723 = vmatmul.bf16.vlgmr.msra.gmra.mxu2 %v1201_v44  ;;  %v1529_v33 = vor.u32 %v1691_v31, %v1528_v30  ;;  %v1533_v35 = vor.u32 %v1690_v32, %v1530_v34  ;;  %v1686_v44 = vld [vmem:[#allocation8 + $0x44] sm:$0xf] }
  0x40   :  { %771 = vmatpush.bf16.msrb.mxu2 %v1669_v42  ;;  %737 = vmatmul.bf16.vlgmr.msra.gmra.mxu3 %v1205_v46  ;;  %v1512_v42 = vld [vmem:[#allocation8 + $0x40] sm:$0xf]  ;;  %v1514_v46 = vld [vmem:[#allocation8 + $0x48] sm:$0xf0] }
  0x41   :  { %785 = vmatpush.bf16.msrb.mxu3 %v1677_v43  ;;  %v1687_v43 = vld [vmem:[#allocation8 + $0x44] sm:$0xf0]  ;;  %v1517_v47 = vor.u32 %v1686_v44, %v1514_v46 }
  0x42   :  { %744 = vmatpush.bf16.msrb.mxu0 %v1652_v48  ;;  %v1513_v45 = vor.u32 %v1687_v43, %v1512_v42  ;;  %v1504_v48 = vld [vmem:[#allocation8 + $0x30] sm:$0xf]  ;;  %v816_v42 = vld [vmem:[%s2036_s4] sm:$0x3] }
  0x43   :  { %758 = vmatpush.bf16.msrb.mxu1 %v1660_v49  ;;  %v1685_v49 = vld [vmem:[#allocation8 + $0x34] sm:$0xf0]  ;;  %v818_v43 = vperm.slane %v816_v42, 0  ;;  %v819_v44 = vperm.slane %v816_v42, 1 }
  0x44   :  { %772 = vmatpush.bf16.msrb.mxu2 %v1668_v50  ;;  %v1684_v50 = vld [vmem:[#allocation8 + $0x34] sm:$0xf] }
  0x45   :  { %786 = vmatpush.bf16.msrb.mxu3 %v1676_v51  ;;  %v1505_v51 = vor.u32 %v1685_v49, %v1504_v48 }
  0x46   :  { %745 = vmatpush.bf16.msrb.mxu0 %v1651_v52  ;;  %v1506_v52 = vld [vmem:[#allocation8 + $0x38] sm:$0xf0] }
  0x47   :  { %759 = vmatpush.bf16.msrb.mxu1 %v1659_v53  ;;  %v1509_v53 = vor.u32 %v1684_v50, %v1506_v52 }
  0x48   :  { %773 = vmatpush.bf16.msrb.mxu2 %v1667_v54  ;;  %v1496_v54 = vld [vmem:[#allocation8 + $0x20] sm:$0xf] }
  0x49   :  { %787 = vmatpush.bf16.msrb.mxu3 %v1675_v55  ;;  %v1683_v55 = vld [vmem:[#allocation8 + $0x24] sm:$0xf0] }
  0x4a   :  { %746 = vmatpush.bf16.msrb.mxu0 %v1650_v56  ;;  %v1682_v56 = vld [vmem:[#allocation8 + $0x24] sm:$0xf] }
  0x4b   :  { %760 = vmatpush.bf16.msrb.mxu1 %v1658_v57  ;;  %v1497_v57 = vor.u32 %v1683_v55, %v1496_v54 }
  0x4c   :  { %774 = vmatpush.bf16.msrb.mxu2 %v1666_v58  ;;  %v1498_v58 = vld [vmem:[#allocation8 + $0x28] sm:$0xf0] }
  0x4d   :  { %788 = vmatpush.bf16.msrb.mxu3 %v1674_v59  ;;  %v1501_v59 = vor.u32 %v1682_v56, %v1498_v58 }
  0x4e   :  { %747 = vmatpush.bf16.msrb.mxu0 %v1649_v60  ;;  %v1488_v60 = vld [vmem:[#allocation8 + $0x10] sm:$0xf] }
  0x4f   :  { %761 = vmatpush.bf16.msrb.mxu1 %v1657_v61  ;;  %v1681_v61 = vld [vmem:[#allocation8 + $0x14] sm:$0xf0] }
  0x50   :  { %775 = vmatpush.bf16.msrb.mxu2 %v1665_v62  ;;  %v1680_v62 = vld [vmem:[#allocation8 + $0x14] sm:$0xf] }
  0x51   :  { %789 = vmatpush.bf16.msrb.mxu3 %v1673_v63  ;;  %v1489_v63 = vor.u32 %v1681_v61, %v1488_v60 }
  0x52   :  { %748 = vmatpush.bf16.msrb.mxu0 %v1648_v0  ;;  %v1490_v0 = vld [vmem:[#allocation8 + $0x18] sm:$0xf0] }
  0x53   :  { %762 = vmatpush.bf16.msrb.mxu1 %v1656_v1 }
  0x54   :  { %776 = vmatpush.bf16.msrb.mxu2 %v1664_v2  ;;  %v1493_v2 = vor.u32 %v1680_v62, %v1490_v0 }
  0x55   :  { %790 = vmatpush.bf16.msrb.mxu3 %v1672_v3  ;;  %v1480_v3 = vld [vmem:[#allocation8] sm:$0xf] }
  0x56   :  { %749 = vmatpush.bf16.msrb.mxu0 %v1647_v4  ;;  %v1679_v4 = vld [vmem:[#allocation8 + $0x4] sm:$0xf0] }
  0x57   :  { %763 = vmatpush.bf16.msrb.mxu1 %v1655_v5  ;;  %v1678_v5 = vld [vmem:[#allocation8 + $0x4] sm:$0xf] }
  0x58   :  { %777 = vmatpush.bf16.msrb.mxu2 %v1663_v6 }
  0x59   :  { %791 = vmatpush.bf16.msrb.mxu3 %v1671_v7  ;;  %v1481_v7 = vor.u32 %v1679_v4, %v1480_v3 }
  0x5a   :  { %750 = vmatpush.bf16.msrb.mxu0 %v1646_v8  ;;  %v1482_v8 = vld [vmem:[#allocation8 + $0x8] sm:$0xf0] }
  0x5b   :  { %764 = vmatpush.bf16.msrb.mxu1 %v1654_v9  ;;  %v1485_v9 = vor.u32 %v1678_v5, %v1482_v8  ;;  %v1701_v5 = vld [vmem:[#allocation11 + $0x38] sm:$0xff]  ;;  %v1708_v8 = vld [vmem:[#allocation11 + $0x70] sm:$0xff] }
  0x5c   :  { %778 = vmatpush.bf16.msrb.mxu2 %v1662_v10 }
  0x5d   :  { %792 = vmatpush.bf16.msrb.mxu3 %v1670_v11  ;;  %751 = vmatmul.bf16.vlgmr.msrb.gmra.mxu0 %v1209_v20 }
  0x5e   :  { %765 = vmatmul.bf16.vlgmr.msrb.gmra.mxu1 %v1213_v21  ;;  %902 = vmatpush.bf16.msra.mxu0 %v1537_v27 }
  0x5f   :  { %779 = vmatmul.bf16.vlgmr.msrb.gmra.mxu2 %v1217_v22  ;;  %916 = vmatpush.bf16.msra.mxu1 %v1541_v29 }
  0x60   :  { %793 = vmatmul.bf16.vlgmr.msrb.gmra.mxu3 %v1221_v23  ;;  %1138 = vmatpush.bf16.msra.mxu2 %v1701_v5 }
  0x62   :  { %903 = vmatpush.bf16.msra.mxu0 %v1529_v33 }
  0x63   :  { %917 = vmatpush.bf16.msra.mxu1 %v1533_v35 }
  0x66   :  { %904 = vmatpush.bf16.msra.mxu0 %v1521_v40 }
  0x67   :  { %918 = vmatpush.bf16.msra.mxu1 %v1525_v41 }
  0x6a   :  { %905 = vmatpush.bf16.msra.mxu0 %v1513_v45 }
  0x6b   :  { %919 = vmatpush.bf16.msra.mxu1 %v1517_v47 }
  0x6e   :  { %906 = vmatpush.bf16.msra.mxu0 %v1505_v51 }
  0x6f   :  { %920 = vmatpush.bf16.msra.mxu1 %v1509_v53 }
  0x72   :  { %907 = vmatpush.bf16.msra.mxu0 %v1497_v57 }
  0x73   :  { %921 = vmatpush.bf16.msra.mxu1 %v1501_v59 }
  0x76   :  { %908 = vmatpush.bf16.msra.mxu0 %v1489_v63 }
  0x77   :  { %922 = vmatpush.bf16.msra.mxu1 %v1493_v2 }
  0x7a   :  { %909 = vmatpush.bf16.msra.mxu0 %v1481_v7  ;;  %v1700_v7 = vld [vmem:[#allocation11 + $0x30] sm:$0xff] }
  0x7b   :  { %923 = vmatpush.bf16.msra.mxu1 %v1485_v9  ;;  %1139 = vmatpush.bf16.msra.mxu2 %v1700_v7  ;;  %v1699_v9 = vld [vmem:[#allocation11 + $0x28] sm:$0xff] }
  0x7f   :  { %1140 = vmatpush.bf16.msra.mxu2 %v1699_v9 }
  0xba   :  { %v696_v1 = vpop.f32.mrf.mxu0 }
  0xbb   :  { %v710_v6 = vpop.f32.mrf.mxu1  ;;  %v697_v14 = vadd.f32 %v1723_v12, %v696_v1 }
  0xbd   :  { %v711_v17 = vadd.f32 %v710_v6, %v697_v14  ;;  %v1709_v6 = vld [vmem:[#allocation11 + $0x78] sm:$0xff] }
  0xbe   :  { %1152 = vmatpush.bf16.msra.mxu3 %v1709_v6  ;;  %v1705_v14 = vld [vmem:[#allocation11 + $0x58] sm:$0xff] }
  0xc2   :  { %v724_v10 = vpop.f32.mrf.mxu2  ;;  %v698_v13 = vpop.f32.mrf.mxu0  ;;  %1153 = vmatpush.bf16.msra.mxu3 %v1708_v8 }
  0xc3   :  { %v738_v11 = vpop.f32.mrf.mxu3  ;;  %v712_v15 = vpop.f32.mrf.mxu1  ;;  %v699_v16 = vadd.f32 %v1723_v12, %v698_v13  ;;  %v725_v22 = vadd.f32 %v724_v10, %v711_v17  ;;  %v1707_v10 = vld [vmem:[#allocation11 + $0x68] sm:$0xff]  ;;  %v1706_v12 = vld [vmem:[#allocation11 + $0x60] sm:$0xff]  ;;  %v1697_v13 = vld [vmem:[#allocation11 + $0x18] sm:$0xff] }
  0xc5   :  { %v713_v20 = vadd.f32 %v712_v15, %v699_v16  ;;  %v739_v25 = vadd.f32 %v738_v11, %v725_v22  ;;  %v1698_v11 = vld [vmem:[#allocation11 + $0x20] sm:$0xff]  ;;  %v1696_v15 = vld [vmem:[#allocation11 + $0x10] sm:$0xff] }
  0xc6   :  { %1154 = vmatpush.bf16.msra.mxu3 %v1707_v10  ;;  %1141 = vmatpush.bf16.msra.mxu2 %v1698_v11  ;;  %v1704_v16 = vld [vmem:[#allocation11 + $0x50] sm:$0xff]  ;;  %v1702_v22 = vld [vmem:[#allocation11 + $0x40] sm:$0xff] }
  0xca   :  { %v726_v18 = vpop.f32.mrf.mxu2  ;;  %1155 = vmatpush.bf16.msra.mxu3 %v1706_v12  ;;  %1142 = vmatpush.bf16.msra.mxu2 %v1697_v13 }
  0xcb   :  { %v740_v19 = vpop.f32.mrf.mxu3  ;;  %v727_v24 = vadd.f32 %v726_v18, %v713_v20  ;;  %v1695_v18 = vld [vmem:[#allocation11 + $0x8] sm:$0xff] }
  0xcd   :  { %v741_v28 = vadd.f32 %v740_v19, %v727_v24  ;;  %v1703_v19 = vld [vmem:[#allocation11 + $0x48] sm:$0xff] }
  0xce   :  { %1156 = vmatpush.bf16.msra.mxu3 %v1705_v14  ;;  %1143 = vmatpush.bf16.msra.mxu2 %v1696_v15 }
  0xd2   :  { %1157 = vmatpush.bf16.msra.mxu3 %v1704_v16  ;;  %1144 = vmatpush.bf16.msra.mxu2 %v1695_v18 }
  0xd6   :  { %1158 = vmatpush.bf16.msra.mxu3 %v1703_v19 }
  0xda   :  { %v752_v21 = vpop.f32.mrf.mxu0  ;;  %1159 = vmatpush.bf16.msra.mxu3 %v1702_v22 }
  0xdb   :  { %v766_v23 = vpop.f32.mrf.mxu1  ;;  %v753_v29 = vadd.f32 %v752_v21, %v739_v25  ;;  %v1694_v21 = vld [vmem:[#allocation11] sm:$0xff] }
  0xdc   :  { %1145 = vmatpush.bf16.msra.mxu2 %v1694_v21 }
  0xdd   :  { %v767_v32 = vadd.f32 %v766_v23, %v753_v29 }
  0xe2   :  { %v780_v26 = vpop.f32.mrf.mxu2  ;;  %v754_v30 = vpop.f32.mrf.mxu0 }
  0xe3   :  { %v794_v27 = vpop.f32.mrf.mxu3  ;;  %v755_v31 = vadd.f32 %v754_v30, %v741_v28  ;;  %v768_v33 = vpop.f32.mrf.mxu1  ;;  %v781_v34 = vadd.f32 %v780_v26, %v767_v32 }
  0xe5   :  { %v769_v35 = vadd.f32 %v768_v33, %v755_v31  ;;  %v795_v39 = vadd.f32 %v794_v27, %v781_v34 }
  0xea   :  { %v782_v36 = vpop.f32.mrf.mxu2 }
  0xeb   :  { %v783_v37 = vadd.f32 %v782_v36, %v769_v35  ;;  %v796_v38 = vpop.f32.mrf.mxu3  ;;  %v930_v35 = vld [vmem:[%s2037_s5] sm:$0x3] }
  0xed   :  { %v797_v40 = vadd.f32 %v796_v38, %v783_v37 }
  0xef   :  { %v799_v41 = vpack.c.bf16 %v797_v40, %v795_v39  ;;  %v983_v39 = vperm.slane %v930_v35, 0  ;;  %v984_v40 = vperm.slane %v930_v35, 1 }
  0xf1   :  { %910 = vmatmul.bf16.vlgmr.msra.gmra.mxu0 %v799_v41  ;;  %924 = vmatmul.bf16.vlgmr.msra.gmra.mxu1 %v799_v41 }
 0x16e   :  { %v911_v45 = vpop.f32.mrf.mxu0  ;;  %v925_v46 = vpop.f32.mrf.mxu1 }
 0x16f   :  { %v912_v47 = vadd.f32 %v911_v45, %v818_v43  ;;  %v926_v48 = vadd.f32 %v925_v46, %v819_v44 }
 0x171   :  { %v932_v49 = vadd.f32 %v926_v48, %v912_v47 }
 0x173   :  { %933 = vadd.xlane.f32.xlu0 %v932_v49 }
 0x176   :  { %v913_v50 = vpop.f32.mrf.mxu0  ;;  %v927_v51 = vpop.f32.mrf.mxu1 }
 0x177   :  { %v914_v52 = vadd.f32 %v913_v50, %v818_v43  ;;  %v928_v53 = vadd.f32 %v927_v51, %v819_v44  ;;  %v931_v44 = vld [vmem:[#allocation10] sm:$0x3] }
 0x178   :  { %v993_v49 = vperm.slane %v931_v44, 1 }
 0x179   :  { %v935_v54 = vadd.f32 %v928_v53, %v914_v52 }
 0x17b   :  { %936 = vadd.xlane.f32.xlu0 %v935_v54 }
 0x1e6   :  { %v934_v55 = vpop.xlane.xlu0 %933 }
 0x1e7   :  { %v938_v56 = vmul.f32 0.00390625, %v934_v55 }
 0x1e9   :  { %v2000_v57 = vsub.f32 %v912_v47, %v938_v56  ;;  %v2002_v58 = vsub.f32 %v926_v48, %v938_v56  ;;  %v992_v48 = vperm.slane %v931_v44, 0 }
 0x1eb   :  { %v944_v59 = vmul.f32 %v2000_v57, %v2000_v57  ;;  %v945_v60 = vmul.f32 %v2002_v58, %v2002_v58 }
 0x1ed   :  { %v948_v61 = vadd.f32 %v945_v60, %v944_v59 }
 0x1ee   :  { %v937_v62 = vpop.xlane.xlu0 %936 }
 0x1ef   :  { %v939_v63 = vmul.f32 0.00390625, %v937_v62  ;;  %949 = vadd.xlane.f32.xlu1 %v948_v61 }
 0x1f1   :  { %v2008_v0 = vsub.f32 %v914_v52, %v939_v63  ;;  %v2010_v1 = vsub.f32 %v928_v53, %v939_v63 }
 0x1f3   :  { %v946_v2 = vmul.f32 %v2008_v0, %v2008_v0  ;;  %v947_v3 = vmul.f32 %v2010_v1, %v2010_v1 }
 0x1f5   :  { %v951_v4 = vadd.f32 %v947_v3, %v946_v2 }
 0x1f7   :  { %952 = vadd.xlane.f32.xlu1 %v951_v4 }
 0x262   :  { %v950_v17 = vpop.xlane.xlu1 %949 }
 0x263   :  { %v954_v20 = vmul.f32 0.00390625, %v950_v17 }
 0x265   :  { %v956_v23 = vadd.f32 1e-05, %v954_v20 }
 0x267   :  { %1725 = vrsqrt.f32 %v956_v23  ;;  %vm964_vm1 = vweird.f32 %v956_v23 }
 0x26a   :  { %v953_v24 = vpop.xlane.xlu1 %952 }
 0x26b   :  { %v955_v25 = vmul.f32 0.00390625, %v953_v24 }
 0x26d   :  { %v1726_v26 = vpop.eup %1725  ;;  %v957_v27 = vadd.f32 1e-05, %v955_v25 }
 0x26e   :  { %v959_v28 = vmul.f32 %v1726_v26, %v956_v23  ;;  %vm965_vm0 = vweird.f32 %v1726_v26 }
 0x26f   :  { %1727 = vrsqrt.f32 %v957_v27  ;;  %vm966_vm2 = vmor %vm964_vm1, %vm965_vm0  ;;  %vm974_vm4 = vweird.f32 %v957_v27 }
 0x270   :  { %v960_v29 = vmul.f32 %v1726_v26, %v959_v28 }
 0x272   :  { %v961_v30 = vmul.f32 0.5, %v960_v29 }
 0x274   :  { %v962_v31 = vsub.f32 1.5, %v961_v30 }
 0x275   :  { %v1728_v32 = vpop.eup %1727 }
 0x276   :  { %v963_v33 = vmul.f32 %v1726_v26, %v962_v31  ;;  %v969_v34 = vmul.f32 %v1728_v32, %v957_v27  ;;  %vm975_vm3 = vweird.f32 %v1728_v32 }
 0x277   :  { %vm976_vm5 = vmor %vm974_vm4, %vm975_vm3 }
 0x278   :  { %v967_v36 = vsel %vm966_vm2, %v1726_v26, %v963_v33  ;;  %v970_v37 = vmul.f32 %v1728_v32, %v969_v34 }
 0x279   :  { %v978_v41 = vmul.f32 %v967_v36, %v2000_v57  ;;  %v979_v42 = vmul.f32 %v967_v36, %v2002_v58 }
 0x27a   :  { %v971_v38 = vmul.f32 0.5, %v970_v37 }
 0x27b   :  { %v987_v46 = vmul.f32 %v983_v39, %v978_v41  ;;  %v988_v47 = vmul.f32 %v984_v40, %v979_v42 }
 0x27c   :  { %v972_v43 = vsub.f32 1.5, %v971_v38 }
 0x27d   :  { %v996_v55 = vadd.f32 %v992_v48, %v987_v46  ;;  %v997_v56 = vadd.f32 %v993_v49, %v988_v47 }
 0x27e   :  { %v973_v45 = vmul.f32 %v1728_v32, %v972_v43 }
 0x27f   :  { %v1000_v59 = vmax.f32 %v996_v55, 0.0  ;;  %v1001_v61 = vmax.f32 %v997_v56, 0.0 }
 0x280   :  { %v977_v50 = vsel %vm976_vm5, %v1728_v32, %v973_v45 }
 0x281   :  { %v980_v51 = vmul.f32 %v977_v50, %v2008_v0  ;;  %v981_v52 = vmul.f32 %v977_v50, %v2010_v1  ;;  %v1724_v0 = vld [vmem:[%s2040_s8] ss:$0 sm:$0xff] }
 0x283   :  { %v989_v53 = vmul.f32 %v983_v39, %v980_v51  ;;  %v990_v54 = vmul.f32 %v984_v40, %v981_v52 }
 0x285   :  { %v998_v57 = vadd.f32 %v992_v48, %v989_v53  ;;  %v999_v58 = vadd.f32 %v993_v49, %v990_v54 }
 0x287   :  { %v1002_v60 = vmax.f32 %v998_v57, 0.0  ;;  %v1003_v62 = vmax.f32 %v999_v58, 0.0 }
 0x289   :  { %v1004_v63 = vpack.c.bf16 %v1002_v60, %v1000_v59  ;;  %v1005_v2 = vpack.c.bf16 %v1003_v62, %v1001_v61 }
 0x28b   :  { %1146 = vmatmul.bf16.vlgmr.msra.gmra.mxu2 %v1004_v63  ;;  %1160 = vmatmul.bf16.vlgmr.msra.gmra.mxu3 %v1005_v2 }
 0x30e   :  { %v1147_v3 = vpop.f32.mrf.mxu2  ;;  %v1161_v1 = vpop.f32.mrf.mxu3 }
 0x30f   :  { %v1148_v4 = vadd.f32 %v1724_v0, %v1147_v3 }
 0x311   :  { %v1162_v5 = vadd.f32 %v1161_v1, %v1148_v4 }
 0x313   :  { %1166 = vst [vmem:[#allocation13] sm:$0xff] %v1162_v5 }
 0x316   :  { %v1149_v6 = vpop.f32.mrf.mxu2  ;;  %v1163_v8 = vpop.f32.mrf.mxu3 }
 0x317   :  { %v1150_v7 = vadd.f32 %v1724_v0, %v1149_v6 }
 0x319   :  { %v1164_v9 = vadd.f32 %v1163_v8, %v1150_v7 }
 0x31b   :  { %1167 = vst [vmem:[#allocation13 + $0x8] sm:$0xff] %v1164_v9 }
 0x31c   :  { %1180 = dma.vmem_to_hbm [thread:$0]  %s1173_s3, 256, %s1175_s26, [#allocation4], %s1911_s1, %s1911_s1, %s1912_s21  }
 0x31d   :  { %1905 = dma.done.wait [#allocation4], 256  }
 0x31e   :  { %1906 = vsyncadd [#allocation4], 4294967040 }
 0x31f   :  { %1185 = vsyncpa [#allocation3], 1 }
 0x320   :  { %1186 = vsyncpa [#allocation6], 1 }
 0x321   :  { %1187 = vsyncpa [#allocation9], 1 }
 0x322   :  { %1188 = vsyncpa [#allocation12], 1 }
 0x323   :  { %1189 = vsyncpa [#allocation4], 1 }

</bundles_post_ra>
